<compile_context>
chip_gen: v5e
topology: v5e:2x2
jax: 0.10.0
libtpu: 0.0.40
codegen_flags: <defaults>
</compile_context>

<pallas_src>
import functools

import jax
import jax.numpy as jnp
from jax.experimental import pallas as pl
from jax.experimental.pallas import tpu as pltpu


def _round_up(v, m):
    return (v + m - 1) // m * m


def _vmem_budget_bytes():
    """Generation-aware VMEM budget: ~half physical, capped at 64 MiB."""
    try:
        cap = pltpu.get_tpu_info().vmem_capacity_bytes
    except Exception:
        cap = 64 * 1024 * 1024
    return int(min(max(cap // 2, 32 * 1024 * 1024), 64 * 1024 * 1024))


def build_count_adjacency(edge_index, num_nodes, padded_size=None):
    """Unnormalized count matrix B[i, j] = multiplicity(j->i) as int8, plus
    per-row f32 inverse in-degree inv_deg[i] (0 for isolated nodes)."""
    size = num_nodes if padded_size is None else padded_size
    src, dst = edge_index[0], edge_index[1]
    counts = jnp.zeros((size, size), jnp.float32).at[dst, src].add(1.0)
    deg = counts.sum(axis=1, keepdims=True)
    inv_deg = jnp.where(deg > 0, 1.0 / jnp.maximum(deg, 1.0), 0.0)
    return counts.astype(jnp.int8), inv_deg.astype(jnp.float32)


# --------------------------------------------------------------------------- #
# Kernels
# --------------------------------------------------------------------------- #
def layer1_kernel(a_ref, invdeg_ref, xs_ref, xd_ref, wl1_ref, wr1_ref, b1_ref,
                  w2_ref, b2_ref, gl_ref, root_ref, acc_ref, *, out_pad):
    """SAGEConv-1 (+ReLU) and the fused layer-2 projections for one dest tile.

    Grid = (i: destination-node tile ["parallel"], k: source-node tile ["arbitrary"]).
    acc_ref accumulates B[i, k] @ x[k] over k; at the last k the tile finalizes:
      agg  = inv_deg_i * acc              (f32 mean normalization, post-accumulation)
      h1   = relu(agg @ Wl1 + x_i @ Wr1 + b1)
      g    = h1 @ [Wl2 | Wr2]             (reassociated layer-2 projection, one MXU pass)
      gl   = g[:, :out_pad]               (aggregated by the layer-2 kernel)
      root = g[:, out_pad:] + b2          (layer-2 root term, no aggregation needed)
    """
    k = pl.program_id(1)

    @pl.when(k == 0)
    def _():
        acc_ref[...] = jnp.zeros_like(acc_ref)

    # int8 counts streamed from HBM; cast to bf16 in-vreg (exact) for the MXU.
    acc_ref[...] += jnp.dot(a_ref[...].astype(jnp.bfloat16), xs_ref[...],
                            preferred_element_type=jnp.float32)

    @pl.when(k == pl.num_programs(1) - 1)
    def _():
        agg = (acc_ref[...] * invdeg_ref[...]).astype(jnp.bfloat16)  # f32 mean scale
        h1 = (jnp.dot(agg, wl1_ref[...], preferred_element_type=jnp.float32)
              + jnp.dot(xd_ref[...], wr1_ref[...],
                        preferred_element_type=jnp.float32)
              + b1_ref[...])
        h1 = jnp.maximum(h1, 0.0).astype(jnp.bfloat16)   # relu in f32, bf16 for MXU

        g = jnp.dot(h1, w2_ref[...], preferred_element_type=jnp.float32)
        gl_ref[...] = g[:, :out_pad].astype(jnp.bfloat16)
        root_ref[...] = g[:, out_pad:] + b2_ref[...]


def layer2_kernel(a_ref, invdeg_ref, gl_ref, root_ref, out_ref, acc_ref, *, out_c):
    """Layer-2 aggregation h2 = inv_deg * (B @ gl) + root, then masked log_softmax."""
    k = pl.program_id(1)

    @pl.when(k == 0)
    def _():
        acc_ref[...] = jnp.zeros_like(acc_ref)

    acc_ref[...] += jnp.dot(a_ref[...].astype(jnp.bfloat16), gl_ref[...],
                            preferred_element_type=jnp.float32)

    @pl.when(k == pl.num_programs(1) - 1)
    def _():
        h2 = acc_ref[...] * invdeg_ref[...] + root_ref[...]
        # Mask padded lanes so they do not pollute the softmax normalization.
        lane = jax.lax.broadcasted_iota(jnp.int32, h2.shape, 1)
        h2 = jnp.where(lane < out_c, h2, -jnp.inf)
        m = jnp.max(h2, axis=1, keepdims=True)
        z = h2 - m
        lse = jnp.log(jnp.sum(jnp.exp(z), axis=1, keepdims=True))
        out_ref[...] = z - lse       # lane-dense (128-wide) f32 store


# --------------------------------------------------------------------------- #
# Wrapper
# --------------------------------------------------------------------------- #
def graphsage_forward(x, edge_index, params):
    """x: [N, in_channels] f32, edge_index: [2, E] int32 (rows = src, dst)."""
    n, fin = x.shape
    # NOTE: weights are stored [in, out]; transpose when loading torch Linear weights.
    wl1, bl1, wr1, wl2, bl2, wr2 = params
    hid = wl1.shape[1]
    out_c = wl2.shape[1]

    # ---- padding / tiling ---------------------------------------------------
    n_pad = _round_up(n, 128)
    tile = 128
    for cand in (1024, 512, 256):        # biggest tile that divides n_pad
        if n_pad % cand == 0:
            tile = cand
            break
    tm = tk = tile
    hid_pad = _round_up(hid, 128)              # lane-dense hidden width
    out_pad = _round_up(out_c, 128)            # lane-dense output columns
    grid = (n_pad // tm, n_pad // tk)

    # ---- operand preparation ------------------------------------------------
    # int8 edge counts + f32 inverse degrees (normalization happens in-kernel, f32).
    a_cnt, inv_deg = build_count_adjacency(edge_index, n, n_pad)
    x_p = jnp.zeros((n_pad, fin), jnp.float32).at[:n].set(x).astype(jnp.bfloat16)

    wl1_b = jnp.zeros((fin, hid_pad), jnp.float32).at[:, :hid].set(wl1).astype(jnp.bfloat16)
    wr1_b = jnp.zeros((fin, hid_pad), jnp.float32).at[:, :hid].set(wr1).astype(jnp.bfloat16)
    b1 = jnp.zeros((1, hid_pad), jnp.float32).at[:, :hid].set(bl1.reshape(1, hid))

    wl2_p = jnp.zeros((hid_pad, out_pad), jnp.float32).at[:hid, :out_c].set(wl2)
    wr2_p = jnp.zeros((hid_pad, out_pad), jnp.float32).at[:hid, :out_c].set(wr2)
    w2cat = jnp.concatenate([wl2_p, wr2_p], axis=1).astype(jnp.bfloat16)
    b2 = jnp.zeros((1, out_pad), jnp.float32).at[:, :out_c].set(bl2.reshape(1, out_c))

    cparams = pltpu.CompilerParams(
        dimension_semantics=("parallel", "arbitrary"),
        vmem_limit_bytes=_vmem_budget_bytes())

    # ---- layer 1 (+ layer-2 projections) ------------------------------------
    ce1 = pl.CostEstimate(
        flops=2 * n_pad * n_pad * fin + 4 * n_pad * fin * hid_pad
              + 4 * n_pad * hid_pad * out_pad,
        transcendentals=0,
        bytes_accessed=n_pad * n_pad + 4 * n_pad * fin + 6 * n_pad * out_pad
                       + 2 * (2 * fin * hid_pad + 2 * hid_pad * out_pad)
                       + 4 * n_pad)
    gl, root = pl.pallas_call(
        functools.partial(layer1_kernel, out_pad=out_pad),
        out_shape=(jax.ShapeDtypeStruct((n_pad, out_pad), jnp.bfloat16),
                   jax.ShapeDtypeStruct((n_pad, out_pad), jnp.float32)),
        grid_spec=pltpu.PrefetchScalarGridSpec(
            num_scalar_prefetch=0,
            grid=grid,
            in_specs=[
                pl.BlockSpec((tm, tk), lambda i, k: (i, k)),            # B counts (int8)
                pl.BlockSpec((tm, 1), lambda i, k: (i, 0)),             # inv_deg (dst rows)
                pl.BlockSpec((tk, fin), lambda i, k: (k, 0)),           # x (src rows)
                pl.BlockSpec((tm, fin), lambda i, k: (i, 0)),           # x (dst rows)
                pl.BlockSpec((fin, hid_pad), lambda i, k: (0, 0)),      # Wl1
                pl.BlockSpec((fin, hid_pad), lambda i, k: (0, 0)),      # Wr1
                pl.BlockSpec((1, hid_pad), lambda i, k: (0, 0)),        # b1
                pl.BlockSpec((hid_pad, 2 * out_pad), lambda i, k: (0, 0)),  # [Wl2|Wr2]
                pl.BlockSpec((1, out_pad), lambda i, k: (0, 0)),        # b2
            ],
            out_specs=(
                pl.BlockSpec((tm, out_pad), lambda i, k: (i, 0)),       # gl
                pl.BlockSpec((tm, out_pad), lambda i, k: (i, 0)),       # root
            ),
            scratch_shapes=[pltpu.VMEM((tm, fin), jnp.float32)],
        ),
        compiler_params=cparams,
        cost_estimate=ce1,
    )(a_cnt, inv_deg, x_p, x_p, wl1_b, wr1_b, b1, w2cat, b2)

    # ---- layer 2 aggregation + masked log_softmax ---------------------------
    ce2 = pl.CostEstimate(
        flops=2 * n_pad * n_pad * out_pad + 2 * n_pad * out_pad,
        transcendentals=n_pad * out_pad,
        bytes_accessed=n_pad * n_pad + 10 * n_pad * out_pad + 4 * n_pad)
    out_full = pl.pallas_call(
        functools.partial(layer2_kernel, out_c=out_c),
        out_shape=jax.ShapeDtypeStruct((n_pad, out_pad), jnp.float32),
        grid_spec=pltpu.PrefetchScalarGridSpec(
            num_scalar_prefetch=0,
            grid=grid,
            in_specs=[
                pl.BlockSpec((tm, tk), lambda i, k: (i, k)),        # B counts (int8)
                pl.BlockSpec((tm, 1), lambda i, k: (i, 0)),         # inv_deg (dst rows)
                pl.BlockSpec((tk, out_pad), lambda i, k: (k, 0)),   # gl (src rows)
                pl.BlockSpec((tm, out_pad), lambda i, k: (i, 0)),   # root (dst rows)
            ],
            out_specs=pl.BlockSpec((tm, out_pad), lambda i, k: (i, 0)),
            scratch_shapes=[pltpu.VMEM((tm, out_pad), jnp.float32)],
        ),
        compiler_params=cparams,
        cost_estimate=ce2,
    )(a_cnt, inv_deg, gl, root)

    return out_full[:n, :out_c]


# --------------------------------------------------------------------------- #
# References & init
# --------------------------------------------------------------------------- #
def reference_f32(x, edge_index, params):
    """Pure-f32 reference with the PyTorch module's exact semantics."""
    n = x.shape[0]
    wl1, bl1, wr1, wl2, bl2, wr2 = params
    counts, inv_deg = build_count_adjacency(edge_index, n)
    a = counts.astype(jnp.float32) * inv_deg
    h1 = jax.nn.relu((a @ x) @ wl1 + bl1 + x @ wr1)
    h2 = (a @ h1) @ wl2 + bl2 + h1 @ wr2
    return jax.nn.log_softmax(h2, axis=1)


def reference_matched(x, edge_index, params):
    """Reference with the same bf16 casts / f32 normalization as the kernels."""
    n = x.shape[0]
    wl1, bl1, wr1, wl2, bl2, wr2 = params
    bf = jnp.bfloat16
    counts, inv_deg = build_count_adjacency(edge_index, n)
    a = counts.astype(bf)
    xb = x.astype(bf)
    agg1 = (jnp.dot(a, xb, preferred_element_type=jnp.float32) * inv_deg).astype(bf)
    h1 = (jnp.dot(agg1, wl1.astype(bf), preferred_element_type=jnp.float32)
          + jnp.dot(xb, wr1.astype(bf), preferred_element_type=jnp.float32)
          + bl1)
    h1 = jnp.maximum(h1, 0.0).astype(bf)
    gl = jnp.dot(h1, wl2.astype(bf), preferred_element_type=jnp.float32).astype(bf)
    root = jnp.dot(h1, wr2.astype(bf), preferred_element_type=jnp.float32) + bl2
    h2 = jnp.dot(a, gl, preferred_element_type=jnp.float32) * inv_deg + root
    return jax.nn.log_softmax(h2, axis=1)


def init_params(key, in_channels, hidden_channels, out_channels):
    """Glorot-uniform-ish init. Weights stored [in, out]; biases [1, out]."""
    ks = jax.random.split(key, 6)

    def lin(k, fan_in, fan_out):
        bound = (6.0 / (fan_in + fan_out)) ** 0.5
        return jax.random.uniform(k, (fan_in, fan_out), jnp.float32, -bound, bound)

    def bias(k, fan_in, fan_out):
        bound = 1.0 / (fan_in ** 0.5)
        return jax.random.uniform(k, (1, fan_out), jnp.float32, -bound, bound)

    wl1 = lin(ks[0], in_channels, hidden_channels)
    bl1 = bias(ks[1], in_channels, hidden_channels)
    wr1 = lin(ks[2], in_channels, hidden_channels)
    wl2 = lin(ks[3], hidden_channels, out_channels)
    bl2 = bias(ks[4], hidden_channels, out_channels)
    wr2 = lin(ks[5], hidden_channels, out_channels)
    return (wl1, bl1, wr1, wl2, bl2, wr2)


if __name__ == "__main__":
    key = jax.random.PRNGKey(0)
    k_x, k_e, k_p = jax.random.split(key, 3)

    num_nodes = 16
    num_edges = 48
    in_channels, hidden_channels, out_channels = 8, 32, 8

    x = jax.random.normal(k_x, (num_nodes, in_channels), jnp.float32)
    edge_index = jax.random.randint(k_e, (2, num_edges), 0, num_nodes, jnp.int32)
    params = init_params(k_p, in_channels, hidden_channels, out_channels)

    out = graphsage_forward(x, edge_index, params)
    out = jax.block_until_ready(out)

    assert out.shape == (num_nodes, out_channels)
    # log_softmax rows should exponentiate-sum to ~1
    assert bool(jnp.allclose(jnp.exp(out).sum(axis=1), 1.0, atol=1e-3))
    # tight check vs a reference using the same bf16 MXU casts / f32 mean scaling
    ref_bf = reference_matched(x, edge_index, params)
    assert bool(jnp.allclose(out, ref_bf, atol=5e-3, rtol=5e-3))
    # loose check vs the exact f32 module semantics (bf16 drift tolerance)
    ref_32 = reference_f32(x, edge_index, params)
    assert bool(jnp.allclose(out, ref_32, atol=0.25))
    print("KERNEL_OK")
</pallas_src>

<mosaic_0001>
module attributes {stable_mosaic.version = 11 : i64} {
  func.func @layer1_kernel(%arg0: i32, %arg1: i32, %arg2: memref<128x128xi8, #tpu.memory_space<vmem>>, %arg3: memref<128x1xf32, #tpu.memory_space<vmem>>, %arg4: memref<128x8xbf16, #tpu.memory_space<vmem>>, %arg5: memref<128x8xbf16, #tpu.memory_space<vmem>>, %arg6: memref<8x128xbf16, #tpu.memory_space<vmem>>, %arg7: memref<8x128xbf16, #tpu.memory_space<vmem>>, %arg8: memref<1x128xf32, #tpu.memory_space<vmem>>, %arg9: memref<128x256xbf16, #tpu.memory_space<vmem>>, %arg10: memref<1x128xf32, #tpu.memory_space<vmem>>, %arg11: memref<128x128xbf16, #tpu.memory_space<vmem>>, %arg12: memref<128x128xf32, #tpu.memory_space<vmem>>, %arg13: memref<128x8xf32, #tpu.memory_space<vmem>>) attributes {dimension_semantics = [#tpu.dimension_semantics<parallel>, #tpu.dimension_semantics<arbitrary>], iteration_bounds = array<i64: 1, 1>, scalar_prefetch = 0 : i64, scratch_operands = 1 : i64, tpu.core_type = #tpu.core_type<tc>, window_params = [{transform_indices = @transform_0, window_bounds = array<i64: 128, 128>}, {transform_indices = @transform_1, window_bounds = array<i64: 128, 1>}, {transform_indices = @transform_2, window_bounds = array<i64: 128, 8>}, {transform_indices = @transform_3, window_bounds = array<i64: 128, 8>}, {pipeline_mode = #tpu.pipeline_mode<synchronous>, transform_indices = @transform_4, window_bounds = array<i64: 8, 128>}, {pipeline_mode = #tpu.pipeline_mode<synchronous>, transform_indices = @transform_5, window_bounds = array<i64: 8, 128>}, {pipeline_mode = #tpu.pipeline_mode<synchronous>, transform_indices = @transform_6, window_bounds = array<i64: 1, 128>}, {pipeline_mode = #tpu.pipeline_mode<synchronous>, transform_indices = @transform_7, window_bounds = array<i64: 128, 256>}, {pipeline_mode = #tpu.pipeline_mode<synchronous>, transform_indices = @transform_8, window_bounds = array<i64: 1, 128>}, {transform_indices = @transform_9, window_bounds = array<i64: 128, 128>}, {transform_indices = @transform_10, window_bounds = array<i64: 128, 128>}]} {
    %c0_i32 = arith.constant 0 : i32
    %0 = arith.cmpi eq, %arg1, %c0_i32 : i32
    %1 = arith.extui %0 : i1 to i32
    %c0_i32_0 = arith.constant 0 : i32
    %2 = arith.cmpi ne, %1, %c0_i32_0 : i32
    scf.if %2 {
      %cst_10 = arith.constant 0.000000e+00 : f32
      %13 = vector.broadcast %cst_10 : f32 to vector<128x8xf32>
      %c0_11 = arith.constant 0 : index
      %c0_12 = arith.constant 0 : index
      %14 = vector.load %arg13[%c0_11, %c0_12] : memref<128x8xf32, #tpu.memory_space<vmem>>, vector<128x8xf32>
      tpu.vector_store %arg13[%c0_11, %c0_12], %13 {strides = array<i32>} : memref<128x8xf32, #tpu.memory_space<vmem>>, vector<128x8xf32>,
    } else {
    }
    %c0 = arith.constant 0 : index
    %c0_1 = arith.constant 0 : index
    %3 = vector.load %arg13[%c0, %c0_1] : memref<128x8xf32, #tpu.memory_space<vmem>>, vector<128x8xf32>
    %c0_2 = arith.constant 0 : index
    %c0_3 = arith.constant 0 : index
    %4 = vector.load %arg2[%c0_2, %c0_3] : memref<128x128xi8, #tpu.memory_space<vmem>>, vector<128x128xi8>
    %5 = arith.sitofp %4 : vector<128x128xi8> to vector<128x128xbf16>
    %c0_4 = arith.constant 0 : index
    %c0_5 = arith.constant 0 : index
    %6 = vector.load %arg4[%c0_4, %c0_5] : memref<128x8xbf16, #tpu.memory_space<vmem>>, vector<128x8xbf16>
    %cst = arith.constant dense<0.000000e+00> : vector<128x8xf32>
    %7 = tpu.matmul %5, %6, %cst {dimension_numbers = #tpu.dot_dimension_numbers<[1], [0], [0], [1], [0, 0, 1, 1], [], []>} : vector<128x128xbf16>, vector<128x8xbf16>, vector<128x8xf32> -> vector<128x8xf32>
    %8 = arith.addf %3, %7 : vector<128x8xf32>
    %c0_6 = arith.constant 0 : index
    %c0_7 = arith.constant 0 : index
    %9 = vector.load %arg13[%c0_6, %c0_7] : memref<128x8xf32, #tpu.memory_space<vmem>>, vector<128x8xf32>
    tpu.vector_store %arg13[%c0_6, %c0_7], %8 {strides = array<i32>} : memref<128x8xf32, #tpu.memory_space<vmem>>, vector<128x8xf32>,
    %c0_i32_8 = arith.constant 0 : i32
    %10 = arith.cmpi eq, %arg1, %c0_i32_8 : i32
    %11 = arith.extui %10 : i1 to i32
    %c0_i32_9 = arith.constant 0 : i32
    %12 = arith.cmpi ne, %11, %c0_i32_9 : i32
    scf.if %12 {
      %c0_10 = arith.constant 0 : index
      %c0_11 = arith.constant 0 : index
      %13 = vector.load %arg13[%c0_10, %c0_11] : memref<128x8xf32, #tpu.memory_space<vmem>>, vector<128x8xf32>
      %c0_12 = arith.constant 0 : index
      %c0_13 = arith.constant 0 : index
      %14 = vector.load %arg3[%c0_12, %c0_13] : memref<128x1xf32, #tpu.memory_space<vmem>>, vector<128x1xf32>
      %15 = vector.broadcast %14 : vector<128x1xf32> to vector<128x8xf32>
      %16 = arith.mulf %13, %15 : vector<128x8xf32>
      %17 = arith.truncf %16 : vector<128x8xf32> to vector<128x8xbf16>
      %c0_14 = arith.constant 0 : index
      %c0_15 = arith.constant 0 : index
      %18 = vector.load %arg6[%c0_14, %c0_15] : memref<8x128xbf16, #tpu.memory_space<vmem>>, vector<8x128xbf16>
      %cst_16 = arith.constant dense<0.000000e+00> : vector<128x128xf32>
      %19 = tpu.matmul %17, %18, %cst_16 {dimension_numbers = #tpu.dot_dimension_numbers<[1], [0], [0], [1], [0, 0, 1, 1], [], []>} : vector<128x8xbf16>, vector<8x128xbf16>, vector<128x128xf32> -> vector<128x128xf32>
      %c0_17 = arith.constant 0 : index
      %c0_18 = arith.constant 0 : index
      %20 = vector.load %arg5[%c0_17, %c0_18] : memref<128x8xbf16, #tpu.memory_space<vmem>>, vector<128x8xbf16>
      %c0_19 = arith.constant 0 : index
      %c0_20 = arith.constant 0 : index
      %21 = vector.load %arg7[%c0_19, %c0_20] : memref<8x128xbf16, #tpu.memory_space<vmem>>, vector<8x128xbf16>
      %cst_21 = arith.constant dense<0.000000e+00> : vector<128x128xf32>
      %22 = tpu.matmul %20, %21, %cst_21 {dimension_numbers = #tpu.dot_dimension_numbers<[1], [0], [0], [1], [0, 0, 1, 1], [], []>} : vector<128x8xbf16>, vector<8x128xbf16>, vector<128x128xf32> -> vector<128x128xf32>
      %23 = arith.addf %19, %22 : vector<128x128xf32>
      %c0_22 = arith.constant 0 : index
      %c0_23 = arith.constant 0 : index
      %24 = vector.load %arg8[%c0_22, %c0_23] : memref<1x128xf32, #tpu.memory_space<vmem>>, vector<1x128xf32>
      %25 = vector.broadcast %24 : vector<1x128xf32> to vector<128x128xf32>
      %26 = arith.addf %23, %25 : vector<128x128xf32>
      %cst_24 = arith.constant 0.000000e+00 : f32
      %27 = vector.broadcast %cst_24 : f32 to vector<128x128xf32>
      %28 = arith.maximumf %26, %27 : vector<128x128xf32>
      %29 = arith.truncf %28 : vector<128x128xf32> to vector<128x128xbf16>
      %c0_25 = arith.constant 0 : index
      %c0_26 = arith.constant 0 : index
      %30 = vector.load %arg9[%c0_25, %c0_26] : memref<128x256xbf16, #tpu.memory_space<vmem>>, vector<128x256xbf16>
      %cst_27 = arith.constant dense<0.000000e+00> : vector<128x256xf32>
      %31 = tpu.matmul %29, %30, %cst_27 {dimension_numbers = #tpu.dot_dimension_numbers<[1], [0], [0], [1], [0, 0, 1, 1], [], []>} : vector<128x128xbf16>, vector<128x256xbf16>, vector<128x256xf32> -> vector<128x256xf32>
      %32 = vector.extract_strided_slice %31 {offsets = [0, 0], sizes = [128, 128], strides = [1, 1]} : vector<128x256xf32> to vector<128x128xf32>
      %33 = arith.truncf %32 : vector<128x128xf32> to vector<128x128xbf16>
      %c0_28 = arith.constant 0 : index
      %c0_29 = arith.constant 0 : index
      %34 = vector.load %arg11[%c0_28, %c0_29] : memref<128x128xbf16, #tpu.memory_space<vmem>>, vector<128x128xbf16>
      tpu.vector_store %arg11[%c0_28, %c0_29], %33 {strides = array<i32>} : memref<128x128xbf16, #tpu.memory_space<vmem>>, vector<128x128xbf16>,
      %35 = vector.extract_strided_slice %31 {offsets = [0, 128], sizes = [128, 128], strides = [1, 1]} : vector<128x256xf32> to vector<128x128xf32>
      %c0_30 = arith.constant 0 : index
      %c0_31 = arith.constant 0 : index
      %36 = vector.load %arg10[%c0_30, %c0_31] : memref<1x128xf32, #tpu.memory_space<vmem>>, vector<1x128xf32>
      %37 = vector.broadcast %36 : vector<1x128xf32> to vector<128x128xf32>
      %38 = arith.addf %35, %37 : vector<128x128xf32>
      %c0_32 = arith.constant 0 : index
      %c0_33 = arith.constant 0 : index
      %39 = vector.load %arg12[%c0_32, %c0_33] : memref<128x128xf32, #tpu.memory_space<vmem>>, vector<128x128xf32>
      tpu.vector_store %arg12[%c0_32, %c0_33], %38 {strides = array<i32>} : memref<128x128xf32, #tpu.memory_space<vmem>>, vector<128x128xf32>,
    } else {
    }
    return
  }
  func.func @transform_0(%arg0: i32, %arg1: i32) -> (i32, i32) {
    %c0_i32 = arith.constant 0 : i32
    return %arg0, %arg1 : i32, i32
  }
  func.func @transform_1(%arg0: i32, %arg1: i32) -> (i32, i32) {
    %c0_i32 = arith.constant 0 : i32
    %c0_i32_0 = arith.constant 0 : i32
    return %arg0, %c0_i32 : i32, i32
  }
  func.func @transform_2(%arg0: i32, %arg1: i32) -> (i32, i32) {
    %c0_i32 = arith.constant 0 : i32
    %c0_i32_0 = arith.constant 0 : i32
    return %arg1, %c0_i32 : i32, i32
  }
  func.func @transform_3(%arg0: i32, %arg1: i32) -> (i32, i32) {
    %c0_i32 = arith.constant 0 : i32
    %c0_i32_0 = arith.constant 0 : i32
    return %arg0, %c0_i32 : i32, i32
  }
  func.func @transform_4(%arg0: i32, %arg1: i32) -> (i32, i32) {
    %c0_i32 = arith.constant 0 : i32
    %c0_i32_0 = arith.constant 0 : i32
    %c0_i32_1 = arith.constant 0 : i32
    return %c0_i32, %c0_i32_0 : i32, i32
  }
  func.func @transform_5(%arg0: i32, %arg1: i32) -> (i32, i32) {
    %c0_i32 = arith.constant 0 : i32
    %c0_i32_0 = arith.constant 0 : i32
    %c0_i32_1 = arith.constant 0 : i32
    return %c0_i32, %c0_i32_0 : i32, i32
  }
  func.func @transform_6(%arg0: i32, %arg1: i32) -> (i32, i32) {
    %c0_i32 = arith.constant 0 : i32
    %c0_i32_0 = arith.constant 0 : i32
    %c0_i32_1 = arith.constant 0 : i32
    return %c0_i32, %c0_i32_0 : i32, i32
  }
  func.func @transform_7(%arg0: i32, %arg1: i32) -> (i32, i32) {
    %c0_i32 = arith.constant 0 : i32
    %c0_i32_0 = arith.constant 0 : i32
    %c0_i32_1 = arith.constant 0 : i32
    return %c0_i32, %c0_i32_0 : i32, i32
  }
  func.func @transform_8(%arg0: i32, %arg1: i32) -> (i32, i32) {
    %c0_i32 = arith.constant 0 : i32
    %c0_i32_0 = arith.constant 0 : i32
    %c0_i32_1 = arith.constant 0 : i32
    return %c0_i32, %c0_i32_0 : i32, i32
  }
  func.func @transform_9(%arg0: i32, %arg1: i32) -> (i32, i32) {
    %c0_i32 = arith.constant 0 : i32
    %c0_i32_0 = arith.constant 0 : i32
    return %arg0, %c0_i32 : i32, i32
  }
  func.func @transform_10(%arg0: i32, %arg1: i32) -> (i32, i32) {
    %c0_i32 = arith.constant 0 : i32
    %c0_i32_0 = arith.constant 0 : i32
    return %arg0, %c0_i32 : i32, i32
  }
}

</mosaic_0001>

<bundles_post_ra>
// kernel: tpu_custom_call.1
= control target key start
LH: loop header
LB: loop body
LE: loop exit
PB: predicated region body
PF: predicated region fallthrough
CT: control target
= control target key end

     0   :  { %16 = vsyncpa [#allocation4], 0  ;;  %v1247_v1 = vmov 0   ;;  %s1636_s0 = inlined_call_operand.vmem [shape: s8[128,128], index: 0, kind: input, shape index: {}]   ;;  %s1637_s1 = inlined_call_operand.vmem [shape: f32[128,1], index: 1, kind: input, shape index: {}]   ;;  %s1638_s2 = inlined_call_operand.vmem [shape: bf16[128,8], index: 2, kind: input, shape index: {}]   ;;  %s1639_s3 = inlined_call_operand.vmem [shape: bf16[128,8], index: 3, kind: input, shape index: {}]   ;;  %s1640_s4 = inlined_call_operand.vmem [shape: bf16[8,128], index: 4, kind: input, shape index: {}]   ;;  %s1641_s5 = inlined_call_operand.vmem [shape: bf16[8,128], index: 5, kind: input, shape index: {}]   ;;  %s1642_s6 = inlined_call_operand.vmem [shape: f32[1,128], index: 6, kind: input, shape index: {}]   ;;  %s1643_s7 = inlined_call_operand.vmem [shape: bf16[128,256], index: 7, kind: input, shape index: {}]   ;;  %s1644_s8 = inlined_call_operand.vmem [shape: f32[1,128], index: 8, kind: input, shape index: {}]   ;;  %s1645_s9 = inlined_call_operand.hbm [shape: bf16[128,128], index: 9, kind: output, shape index: {0}]   ;;  %s1646_s10 = inlined_call_operand.hbm [shape: f32[128,128], index: 10, kind: output, shape index: {1}]  }
   0x1   :  { %v1107_v0 = vld [vmem:[%s1638_s2 + $0x38] sm:$0xff]  ;;  %1190 = vset.pattern.permute.xlu0 %v1247_v1  ;;  %v283_v2 = vld [vmem:[%s1637_s1] sm:$0xff]  ;;  %1191 = vset.pattern.permute.xlu1 %v1247_v1  ;;  %v1106_v3 = vld [vmem:[%s1638_s2 + $0x30] sm:$0xff] }
   0x2   :  { %182 = vmatpush.bf16.msra.mxu0 %v1107_v0  ;;  %301 = vperm.xlu0 %1190, %v283_v2   ;;  %v285_v4 = vld [vmem:[%s1637_s1 + $0x10] sm:$0xff]  ;;  %v1105_v5 = vld [vmem:[%s1638_s2 + $0x28] sm:$0xff] }
   0x3   :  { %1192 = vset.pattern.permute.xlu2 %v1247_v1  ;;  %311 = vperm.xlu1 %1191, %v285_v4  }
   0x6   :  { %183 = vmatpush.bf16.msra.mxu0 %v1106_v3 }
   0x7   :  { %17 = vsyncpa [#allocation6], 0  ;;  %v284_v6 = vld [vmem:[%s1637_s1 + $0x8] sm:$0xff]  ;;  %v1104_v7 = vld [vmem:[%s1638_s2 + $0x20] sm:$0xff]  ;;  %vm485_vm0 = vcmask 1043456   ;;  %vm41_vm1 = vcmask 64512  }
   0x8   :  { %v286_v8 = vld [vmem:[%s1637_s1 + $0x18] sm:$0xff]  ;;  %v289_v10 = vld [vmem:[%s1637_s1 + $0x30] sm:$0xff]  ;;  %v420_v11 = vld [vmem:[%s1641_s5] sm:$0xf]  ;;  %v1248_v2 = vmov 0.0   ;;  %s939_s13 = sshll.u32 %s1646_s10, 4  ;;  %s940_s13 = int_to_ptr.hbm [resolvable:$true] %s939_s13 }
   0x9   :  { %v1103_v9 = vld [vmem:[%s1638_s2 + $0x18] sm:$0xff]  ;;  %v1102_v12 = vld [vmem:[%s1638_s2 + $0x10] sm:$0xff]  ;;  %v74_v13 = vld [vmem:[%s1636_s0] sm:$0xff]  ;;  %v487_v15 = vsel %vm485_vm0, %v420_v11, 0  ;;  %42 = vst.msk [vmem:[#allocation2] sm:$0xff] %vm41_vm1, %v1248_v2  ;;  %s1250_s14 = smov [#allocation3]  }
   0xa   :  { %184 = vmatpush.bf16.msra.mxu0 %v1105_v5  ;;  %306 = vperm.xlu0 %1190, %v284_v6   ;;  %v290_v14 = vld [vmem:[%s1637_s1 + $0x38] sm:$0xff]  ;;  %v78_v16 = vunpack.c.0.s8 %v74_v13  ;;  %v79_v17 = vunpack.c.1.s8 %v74_v13  ;;  %v1101_v18 = vld [vmem:[%s1638_s2 + $0x8] sm:$0xff]  ;;  %v1100_v22 = vld [vmem:[%s1638_s2] sm:$0xff]  ;;  %v80_v28 = vunpack.c.2.s8 %v74_v13  ;;  %v81_v29 = vunpack.c.3.s8 %v74_v13  ;;  %43 = vst.msk [vmem:[#allocation2 + $0x8] sm:$0xff] %vm41_vm1, %v1248_v2  ;;  %s924_s15 = sshll.u32 %s1250_s14, 4  ;;  %s926_s18 = sshll.u32 %s1645_s9, 4  ;;  %s925_s15 = int_to_ptr.vmem [resolvable:$true] %s924_s15  ;;  %s927_s18 = int_to_ptr.hbm [resolvable:$true] %s926_s18 }
   0xb   :  { %316 = vperm.xlu1 %1191, %v286_v8   ;;  %1180 = vmatpush.bf16.msra.mxu2 %v487_v15  ;;  %v292_v19 = vld [vmem:[%s1637_s1 + $0x48] sm:$0xff]  ;;  %v293_v23 = vld [vmem:[%s1637_s1 + $0x50] sm:$0xff]  ;;  %v295_v25 = vld [vmem:[%s1637_s1 + $0x60] sm:$0xff]  ;;  %44 = vst.msk [vmem:[#allocation2 + $0x10] sm:$0xff] %vm41_vm1, %v1248_v2  ;;  %s1251_s19 = smov 128   ;;  %s1252_s20 = smov 8  }
   0xc   :  { %1179 = vmatpush.bf16.msra.mxu1 %v487_v15  ;;  %1181 = vmatpush.bf16.msra.mxu3 %v487_v15  ;;  %v94_v20 = vcvt.s32.f32 %v78_v16  ;;  %v95_v21 = vcvt.s32.f32 %v79_v17  ;;  %v287_v26 = vld [vmem:[%s1637_s1 + $0x20] sm:$0xff]  ;;  %v296_v27 = vld [vmem:[%s1637_s1 + $0x68] sm:$0xff]  ;;  %v298_v30 = vld [vmem:[%s1637_s1 + $0x78] sm:$0xff]  ;;  %v96_v31 = vcvt.s32.f32 %v80_v28  ;;  %v97_v32 = vcvt.s32.f32 %v81_v29  ;;  %45 = vst.msk [vmem:[#allocation2 + $0x18] sm:$0xff] %vm41_vm1, %v1248_v2  ;;  %s1253_s10 = smov 64   ;;  %s1254_s5 = smov 4  }
   0xd   :  { %321 = vperm.xlu2 %1192, %v287_v26   ;;  %v288_v34 = vld [vmem:[%s1637_s1 + $0x28] sm:$0xff]  ;;  %v291_v38 = vld [vmem:[%s1637_s1 + $0x40] sm:$0xff]  ;;  %v294_v42 = vld [vmem:[%s1637_s1 + $0x58] sm:$0xff]  ;;  %46 = vst.msk [vmem:[#allocation2 + $0x20] sm:$0xff] %vm41_vm1, %v1248_v2 }
   0xe   :  { %185 = vmatpush.bf16.msra.mxu0 %v1104_v7  ;;  %v110_v24 = vpack.c.bf16 %v95_v21, %v94_v20  ;;  %v111_v33 = vpack.c.bf16 %v97_v32, %v96_v31  ;;  %v75_v35 = vld [vmem:[%s1636_s0 + $0x8] sm:$0xff]  ;;  %v297_v45 = vld [vmem:[%s1637_s1 + $0x70] sm:$0xff]  ;;  %v1111_v49 = vld [vmem:[%s1639_s3 + $0x18] sm:$0xff]  ;;  %47 = vst.msk [vmem:[#allocation2 + $0x28] sm:$0xff] %vm41_vm1, %v1248_v2 }
   0xf   :  { %v82_v36 = vunpack.c.0.s8 %v75_v35  ;;  %v83_v37 = vunpack.c.1.s8 %v75_v35  ;;  %v84_v43 = vunpack.c.2.s8 %v75_v35  ;;  %v85_v44 = vunpack.c.3.s8 %v75_v35  ;;  %v76_v50 = vld [vmem:[%s1636_s0 + $0x10] sm:$0xff]  ;;  %1023 = vmatmul.msk.bf16.vlgmr.msra.gmra.mxu2 %vm41_vm1, %v1111_v49  ;;  %v403_v56 = vld [vmem:[%s1640_s4] sm:$0xf]  ;;  %v1113_v0 = vld [vmem:[%s1639_s3 + $0x28] sm:$0xff]  ;;  %48 = vst.msk [vmem:[#allocation2 + $0x30] sm:$0xff] %vm41_vm1, %v1248_v2 }
  0x10   :  { %v86_v51 = vunpack.c.0.s8 %v76_v50  ;;  %v87_v52 = vunpack.c.1.s8 %v76_v50  ;;  %v1112_v57 = vld [vmem:[%s1639_s3 + $0x20] sm:$0xff]  ;;  %v563_v58 = vsel %vm485_vm0, %v403_v56, 0  ;;  %v88_v59 = vunpack.c.2.s8 %v76_v50  ;;  %v77_v1 = vld [vmem:[%s1636_s0 + $0x18] sm:$0xff]  ;;  %49 = vst.msk [vmem:[#allocation2 + $0x38] sm:$0xff] %vm41_vm1, %v1248_v2  ;;  %v1109_v17 = vld [vmem:[%s1639_s3 + $0x8] sm:$0xff] }
  0x11   :  { %v98_v39 = vcvt.s32.f32 %v82_v36  ;;  %v99_v40 = vcvt.s32.f32 %v83_v37  ;;  %v100_v46 = vcvt.s32.f32 %v84_v43  ;;  %v101_v47 = vcvt.s32.f32 %v85_v44  ;;  %572 = vmatpush.bf16.msrb.mxu2 %v563_v58  ;;  %50 = vst.msk [vmem:[#allocation2 + $0x40] sm:$0xff] %vm41_vm1, %v1248_v2  ;;  %v58_v13 = vld [vmem:[#allocation2] sm:$0xff]  ;;  %1021 = vmatmul.msk.bf16.vlgmr.msra.gmra.mxu1 %vm41_vm1, %v1109_v17 }
  0x12   :  { %186 = vmatpush.bf16.msra.mxu0 %v1103_v9  ;;  %331 = vperm.xlu0 %1190, %v289_v10   ;;  %v102_v53 = vcvt.s32.f32 %v86_v51  ;;  %v103_v54 = vcvt.s32.f32 %v87_v52  ;;  %v89_v60 = vunpack.c.3.s8 %v76_v50  ;;  %v104_v61 = vcvt.s32.f32 %v88_v59  ;;  %51 = vst.msk [vmem:[#allocation2 + $0x48] sm:$0xff] %vm41_vm1, %v1248_v2 }
  0x13   :  { %336 = vperm.xlu1 %1191, %v290_v14   ;;  %v112_v41 = vpack.c.bf16 %v99_v40, %v98_v39  ;;  %v113_v48 = vpack.c.bf16 %v101_v47, %v100_v46  ;;  %v90_v3 = vunpack.c.0.s8 %v77_v1  ;;  %v91_v4 = vunpack.c.1.s8 %v77_v1  ;;  %52 = vst.msk [vmem:[#allocation2 + $0x50] sm:$0xff] %vm41_vm1, %v1248_v2  ;;  %v1108_v14 = vld [vmem:[%s1639_s3] sm:$0xff]  ;;  %v61_v32 = vld [vmem:[#allocation2 + $0x18] sm:$0xff] }
  0x14   :  { %v114_v55 = vpack.c.bf16 %v103_v54, %v102_v53  ;;  %v105_v62 = vcvt.s32.f32 %v89_v60  ;;  %53 = vst.msk [vmem:[#allocation2 + $0x58] sm:$0xff] %vm41_vm1, %v1248_v2  ;;  %v92_v8 = vunpack.c.2.s8 %v77_v1  ;;  %v93_v9 = vunpack.c.3.s8 %v77_v1  ;;  %v62_v36 = vld [vmem:[#allocation2 + $0x20] sm:$0xff] }
  0x15   :  { %326 = vperm.xlu2 %1192, %v288_v34   ;;  %v106_v5 = vcvt.s32.f32 %v90_v3  ;;  %v107_v6 = vcvt.s32.f32 %v91_v4  ;;  %54 = vst.msk [vmem:[#allocation2 + $0x60] sm:$0xff] %vm41_vm1, %v1248_v2 }
  0x16   :  { %187 = vmatpush.bf16.msra.mxu0 %v1102_v12  ;;  %v115_v63 = vpack.c.bf16 %v105_v62, %v104_v61  ;;  %55 = vst.msk [vmem:[#allocation2 + $0x68] sm:$0xff] %vm41_vm1, %v1248_v2  ;;  %v108_v10 = vcvt.s32.f32 %v92_v8  ;;  %v109_v11 = vcvt.s32.f32 %v93_v9  ;;  %v64_v49 = vld [vmem:[#allocation2 + $0x30] sm:$0xff] }
  0x17   :  { %v116_v7 = vpack.c.bf16 %v107_v6, %v106_v5  ;;  %56 = vst.msk [vmem:[#allocation2 + $0x70] sm:$0xff] %vm41_vm1, %v1248_v2  ;;  %v65_v58 = vld [vmem:[#allocation2 + $0x38] sm:$0xff] }
  0x18   :  { %57 = vst.msk [vmem:[#allocation2 + $0x78] sm:$0xff] %vm41_vm1, %v1248_v2  ;;  %v117_v12 = vpack.c.bf16 %v109_v11, %v108_v10  ;;  %v66_v61 = vld [vmem:[#allocation2 + $0x40] sm:$0xff]  ;;  %v1114_v10 = vld [vmem:[%s1639_s3 + $0x30] sm:$0xff] }
  0x19   :  { %1026 = vmatmul.msk.bf16.vlgmr.msra.gmra.mxu3 %vm41_vm1, %v1114_v10 }
  0x1a   :  { %188 = vmatpush.bf16.msra.mxu0 %v1101_v18  ;;  %346 = vperm.xlu0 %1190, %v292_v19   ;;  %v59_v18 = vld [vmem:[#allocation2 + $0x8] sm:$0xff]  ;;  %v68_v11 = vld [vmem:[#allocation2 + $0x50] sm:$0xff] }
  0x1b   :  { %351 = vperm.xlu1 %1191, %v293_v23  }
  0x1d   :  { %341 = vperm.xlu2 %1192, %v291_v38  }
  0x1e   :  { %189 = vmatpush.bf16.msra.mxu0 %v1100_v22  ;;  %v60_v22 = vld [vmem:[#allocation2 + $0x10] sm:$0xff] }
  0x1f   :  { %1024 = vmatmul.msk.bf16.gmra.mxu2 %vm41_vm1, %v1112_v57 }
  0x21   :  { %190 = vmatmul.bf16.vlgmr.msra.gmra.mxu0 %v110_v24 }
  0x22   :  { %496 = vmatpush.bf16.msrb.mxu0 %v487_v15  ;;  %361 = vperm.xlu0 %1190, %v295_v25  }
  0x23   :  { %366 = vperm.xlu1 %1191, %v296_v27  }
  0x25   :  { %356 = vperm.xlu2 %1192, %v294_v42  }
  0x2a   :  { %376 = vperm.xlu0 %1190, %v298_v30   ;;  %v1110_v30 = vld [vmem:[%s1639_s3 + $0x10] sm:$0xff] }
  0x2b   :  { %1022 = vmatmul.msk.bf16.gmra.mxu1 %vm41_vm1, %v1110_v30 }
  0x2d   :  { %371 = vperm.xlu2 %1192, %v297_v45   ;;  %v63_v45 = vld [vmem:[#allocation2 + $0x28] sm:$0xff] }
  0x2f   :  { %1025 = vmatmul.msk.bf16.gmra.mxu2 %vm41_vm1, %v1113_v0 }
  0x31   :  { %195 = vmatmul.bf16.gmra.mxu0 %v111_v33 }
  0x41   :  { %200 = vmatmul.bf16.gmra.mxu0 %v112_v41 }
  0x51   :  { %205 = vmatmul.bf16.gmra.mxu0 %v113_v48 }
  0x61   :  { %210 = vmatmul.bf16.gmra.mxu0 %v114_v55 }
  0x67   :  { %v322_v46 = vpop.permute.xlu2 %321 }
  0x6f   :  { %v327_v53 = vpop.permute.xlu2 %326 }
  0x71   :  { %215 = vmatmul.bf16.gmra.mxu0 %v115_v63 }
  0x74   :  { %v302_v19 = vpop.permute.xlu0 %301 }
  0x75   :  { %v312_v33 = vpop.permute.xlu1 %311 }
  0x7c   :  { %v307_v26 = vpop.permute.xlu0 %306 }
  0x7d   :  { %v317_v40 = vpop.permute.xlu1 %316 }
  0x81   :  { %220 = vmatmul.bf16.gmra.mxu0 %v116_v7  ;;  %v67_v7 = vld [vmem:[#allocation2 + $0x48] sm:$0xff] }
  0x84   :  { %v332_v1 = vpop.permute.xlu0 %331 }
  0x85   :  { %v337_v2 = vpop.permute.xlu1 %336 }
  0x8d   :  { %v352_v30 = vpop.permute.xlu1 %351 }
  0x91   :  { %225 = vmatmul.bf16.gmra.mxu0 %v117_v12 }
  0x9e   :  { %v191_v15 = vpop.f32.mrf.mxu0 }
  0x9f   :  { %v231_v16 = vadd.f32 %v191_v15, %v58_v13  ;;  %v347_v15 = vpop.permute.xlu0 %346 }
  0xa1   :  { %248 = vst.msk [vmem:[#allocation2] sm:$0xff] %vm41_vm1, %v231_v16  ;;  %1020 = vmatmul.msk.bf16.vlgmr.msrb.gmra.mxu0 %vm41_vm1, %v1108_v14  ;;  %v342_v16 = vpop.permute.xlu2 %341 }
  0xa6   :  { %v193_v20 = vpop.f32.mrf.mxu0 }
  0xa7   :  { %v232_v21 = vadd.f32 %v193_v20, %v59_v18 }
  0xa8   :  { %v267_v24 = vld [vmem:[#allocation2] sm:$0xff] }
  0xa9   :  { %249 = vst.msk [vmem:[#allocation2 + $0x8] sm:$0xff] %vm41_vm1, %v232_v21  ;;  %v379_v28 = vmul.f32 %v302_v19, %v267_v24  ;;  %v69_v21 = vld [vmem:[#allocation2 + $0x58] sm:$0xff] }
  0xaa   :  { %v1115_v24 = vld [vmem:[%s1639_s3 + $0x38] sm:$0xff] }
  0xab   :  { %1027 = vmatmul.msk.bf16.gmra.mxu3 %vm41_vm1, %v1115_v24 }
  0xae   :  { %v196_v23 = vpop.f32.mrf.mxu0 }
  0xaf   :  { %v233_v25 = vadd.f32 %v196_v23, %v60_v22 }
  0xb0   :  { %v268_v27 = vld [vmem:[#allocation2 + $0x8] sm:$0xff] }
  0xb1   :  { %250 = vst.msk [vmem:[#allocation2 + $0x10] sm:$0xff] %vm41_vm1, %v233_v25  ;;  %v380_v29 = vmul.f32 %v307_v26, %v268_v27  ;;  %v70_v25 = vld [vmem:[#allocation2 + $0x60] sm:$0xff]  ;;  %v1467_v27 = vpop.f32.mrf.mxu2 }
  0xb3   :  { %v395_v31 = vpack.c.bf16 %v380_v29, %v379_v28 }
  0xb5   :  { %1028 = vmatmul.msk.bf16.vlgmr.msrb.gmra.mxu2 %vm41_vm1, %v395_v31  ;;  %v357_v31 = vpop.permute.xlu2 %356 }
  0xb6   :  { %v198_v34 = vpop.f32.mrf.mxu0 }
  0xb7   :  { %v234_v35 = vadd.f32 %v198_v34, %v61_v32 }
  0xb8   :  { %v269_v38 = vld [vmem:[#allocation2 + $0x10] sm:$0xff] }
  0xb9   :  { %251 = vst.msk [vmem:[#allocation2 + $0x18] sm:$0xff] %vm41_vm1, %v234_v35  ;;  %v381_v42 = vmul.f32 %v312_v33, %v269_v38  ;;  %v1131_v38 = vld [vmem:[%s1643_s7 + $0x74] sm:$0xf0] }
  0xbe   :  { %v201_v37 = vpop.f32.mrf.mxu0 }
  0xbf   :  { %v235_v39 = vadd.f32 %v201_v37, %v62_v36  ;;  %v71_v36 = vld [vmem:[#allocation2 + $0x68] sm:$0xff]  ;;  %v1094_v37 = vld [vmem:[%s1643_s7 + $0x70] sm:$0xf] }
  0xc0   :  { %v270_v41 = vld [vmem:[#allocation2 + $0x18] sm:$0xff] }
  0xc1   :  { %252 = vst.msk [vmem:[#allocation2 + $0x20] sm:$0xff] %vm41_vm1, %v235_v39  ;;  %v382_v43 = vmul.f32 %v317_v40, %v270_v41  ;;  %v1130_v39 = vld [vmem:[%s1643_s7 + $0x74] sm:$0xf]  ;;  %v1095_v41 = vor.u32 %v1131_v38, %v1094_v37 }
  0xc3   :  { %v396_v44 = vpack.c.bf16 %v382_v43, %v381_v42  ;;  %v1096_v42 = vld [vmem:[%s1643_s7 + $0x78] sm:$0xf0]  ;;  %v1086_v43 = vld [vmem:[%s1643_s7 + $0x60] sm:$0xf]  ;;  %754 = vmatpush.bf16.msrb.mxu3 %v1095_v41 }
  0xc4   :  { %v1038_v41 = vld [vmem:[%s1643_s7] sm:$0xf] }
  0xc5   :  { %1029 = vmatmul.msk.bf16.gmra.mxu2 %vm41_vm1, %v396_v44  ;;  %v1129_v44 = vld [vmem:[%s1643_s7 + $0x64] sm:$0xf0] }
  0xc6   :  { %v203_v47 = vpop.f32.mrf.mxu0 }
  0xc7   :  { %v236_v48 = vadd.f32 %v203_v47, %v63_v45  ;;  %v1128_v47 = vld [vmem:[%s1643_s7 + $0x64] sm:$0xf] }
  0xc8   :  { %v271_v51 = vld [vmem:[#allocation2 + $0x20] sm:$0xff] }
  0xc9   :  { %253 = vst.msk [vmem:[#allocation2 + $0x28] sm:$0xff] %vm41_vm1, %v236_v48  ;;  %v383_v55 = vmul.f32 %v322_v46, %v271_v51  ;;  %v1099_v46 = vor.u32 %v1130_v39, %v1096_v42  ;;  %v1088_v48 = vld [vmem:[%s1643_s7 + $0x68] sm:$0xf0]  ;;  %v1117_v42 = vld [vmem:[%s1643_s7 + $0x4] sm:$0xf0] }
  0xca   :  { %v1091_v51 = vor.u32 %v1128_v47, %v1088_v48 }
  0xcb   :  { %803 = vmatpush.bf16.msrb.mxu1 %v1099_v46 }
  0xce   :  { %v206_v50 = vpop.f32.mrf.mxu0 }
  0xcf   :  { %v237_v52 = vadd.f32 %v206_v50, %v64_v49  ;;  %v1495_v49 = vpop.f32.mrf.mxu2  ;;  %v1087_v50 = vor.u32 %v1129_v44, %v1086_v43  ;;  %804 = vmatpush.bf16.msrb.mxu1 %v1091_v51  ;;  %v1116_v43 = vld [vmem:[%s1643_s7 + $0x4] sm:$0xf]  ;;  %v1039_v44 = vor.u32 %v1117_v42, %v1038_v41 }
  0xd0   :  { %v272_v54 = vld [vmem:[#allocation2 + $0x28] sm:$0xff] }
  0xd1   :  { %254 = vst.msk [vmem:[#allocation2 + $0x30] sm:$0xff] %vm41_vm1, %v237_v52  ;;  %v384_v56 = vmul.f32 %v327_v53, %v272_v54  ;;  %v1078_v52 = vld [vmem:[%s1643_s7 + $0x50] sm:$0xf]  ;;  %v1127_v53 = vld [vmem:[%s1643_s7 + $0x54] sm:$0xf0]  ;;  %755 = vmatpush.bf16.msrb.mxu3 %v1087_v50 }
  0xd2   :  { %v1126_v54 = vld [vmem:[%s1643_s7 + $0x54] sm:$0xf] }
  0xd3   :  { %v397_v57 = vpack.c.bf16 %v384_v56, %v383_v55  ;;  %v1080_v55 = vld [vmem:[%s1643_s7 + $0x58] sm:$0xf0]  ;;  %v72_v56 = vld [vmem:[#allocation2 + $0x70] sm:$0xff] }
  0xd5   :  { %1030 = vmatmul.msk.bf16.gmra.mxu2 %vm41_vm1, %v397_v57  ;;  %v1079_v57 = vor.u32 %v1127_v53, %v1078_v52  ;;  %v1585_v53 = vld [vmem:[%s1642_s6] ss:$0 sm:$0xff] }
  0xd6   :  { %v208_v59 = vpop.f32.mrf.mxu0 }
  0xd7   :  { %v238_v60 = vadd.f32 %v208_v59, %v65_v58  ;;  %v1083_v58 = vor.u32 %v1126_v54, %v1080_v55  ;;  %v1070_v59 = vld [vmem:[%s1643_s7 + $0x40] sm:$0xf]  ;;  %756 = vmatpush.bf16.msrb.mxu3 %v1079_v57 }
  0xd8   :  { %v273_v63 = vld [vmem:[#allocation2 + $0x30] sm:$0xff] }
  0xd9   :  { %255 = vst.msk [vmem:[#allocation2 + $0x38] sm:$0xff] %vm41_vm1, %v238_v60  ;;  %v385_v4 = vmul.f32 %v332_v1, %v273_v63  ;;  %v1125_v60 = vld [vmem:[%s1643_s7 + $0x44] sm:$0xf0]  ;;  %v1124_v63 = vld [vmem:[%s1643_s7 + $0x44] sm:$0xf]  ;;  %805 = vmatpush.bf16.msrb.mxu1 %v1083_v58  ;;  %v503_v58 = vpop.f32.mrf.mxu1 }
  0xde   :  { %v211_v62 = vpop.f32.mrf.mxu0 }
  0xdf   :  { %v239_v0 = vadd.f32 %v211_v62, %v66_v61 }
  0xe0   :  { %v274_v3 = vld [vmem:[#allocation2 + $0x38] sm:$0xff] }
  0xe1   :  { %256 = vst.msk [vmem:[#allocation2 + $0x40] sm:$0xff] %vm41_vm1, %v239_v0  ;;  %v386_v5 = vmul.f32 %v337_v2, %v274_v3  ;;  %v1072_v0 = vld [vmem:[%s1643_s7 + $0x48] sm:$0xf0]  ;;  %v362_v2 = vpop.permute.xlu0 %361  ;;  %v367_v3 = vpop.permute.xlu1 %366 }
  0xe3   :  { %v398_v6 = vpack.c.bf16 %v386_v5, %v385_v4  ;;  %v1071_v5 = vor.u32 %v1125_v60, %v1070_v59 }
  0xe5   :  { %1031 = vmatmul.msk.bf16.gmra.mxu2 %vm41_vm1, %v398_v6  ;;  %757 = vmatpush.bf16.msrb.mxu3 %v1071_v5 }
  0xe6   :  { %v213_v8 = vpop.f32.mrf.mxu0 }
  0xe7   :  { %v240_v9 = vadd.f32 %v213_v8, %v67_v7  ;;  %v1075_v8 = vor.u32 %v1124_v63, %v1072_v0  ;;  %v505_v0 = vpop.f32.mrf.mxu1 }
  0xe8   :  { %v275_v13 = vld [vmem:[#allocation2 + $0x40] sm:$0xff] }
  0xe9   :  { %257 = vst.msk [vmem:[#allocation2 + $0x48] sm:$0xff] %vm41_vm1, %v240_v9  ;;  %v387_v18 = vmul.f32 %v342_v16, %v275_v13  ;;  %v1523_v9 = vpop.f32.mrf.mxu2  ;;  %806 = vmatpush.bf16.msrb.mxu1 %v1075_v8  ;;  %v1122_v16 = vld [vmem:[%s1643_s7 + $0x34] sm:$0xf] }
  0xee   :  { %v216_v12 = vpop.f32.mrf.mxu0 }
  0xef   :  { %v241_v14 = vadd.f32 %v216_v12, %v68_v11  ;;  %v73_v11 = vld [vmem:[#allocation2 + $0x78] sm:$0xff]  ;;  %v508_v8 = vpop.f32.mrf.mxu1 }
  0xf0   :  { %v276_v17 = vld [vmem:[#allocation2 + $0x48] sm:$0xff] }
  0xf1   :  { %258 = vst.msk [vmem:[#allocation2 + $0x50] sm:$0xff] %vm41_vm1, %v241_v14  ;;  %v388_v19 = vmul.f32 %v347_v15, %v276_v17  ;;  %v1062_v14 = vld [vmem:[%s1643_s7 + $0x30] sm:$0xf]  ;;  %v1123_v15 = vld [vmem:[%s1643_s7 + $0x34] sm:$0xf0] }
  0xf2   :  { %v1063_v17 = vor.u32 %v1123_v15, %v1062_v14 }
  0xf3   :  { %v399_v20 = vpack.c.bf16 %v388_v19, %v387_v18  ;;  %v1064_v18 = vld [vmem:[%s1643_s7 + $0x38] sm:$0xf0] }
  0xf4   :  { %v1067_v19 = vor.u32 %v1122_v16, %v1064_v18  ;;  %758 = vmatpush.bf16.msrb.mxu3 %v1063_v17 }
  0xf5   :  { %1032 = vmatmul.msk.bf16.gmra.mxu2 %vm41_vm1, %v399_v20  ;;  %v1054_v20 = vld [vmem:[%s1643_s7 + $0x20] sm:$0xf] }
  0xf6   :  { %v218_v22 = vpop.f32.mrf.mxu0  ;;  %807 = vmatpush.bf16.msrb.mxu1 %v1067_v19 }
  0xf7   :  { %v242_v23 = vadd.f32 %v218_v22, %v69_v21  ;;  %v1121_v21 = vld [vmem:[%s1643_s7 + $0x24] sm:$0xf0]  ;;  %v1120_v22 = vld [vmem:[%s1643_s7 + $0x24] sm:$0xf] }
  0xf8   :  { %v277_v28 = vld [vmem:[#allocation2 + $0x50] sm:$0xff]  ;;  %v1055_v24 = vor.u32 %v1121_v21, %v1054_v20 }
  0xf9   :  { %259 = vst.msk [vmem:[#allocation2 + $0x58] sm:$0xff] %vm41_vm1, %v242_v23  ;;  %v389_v33 = vmul.f32 %v352_v30, %v277_v28  ;;  %v1548_v23 = vpop.f32.mrf.mxu2  ;;  %v1119_v30 = vld [vmem:[%s1643_s7 + $0x14] sm:$0xf0] }
  0xfa   :  { %759 = vmatpush.bf16.msrb.mxu3 %v1055_v24 }
  0xfe   :  { %v221_v26 = vpop.f32.mrf.mxu0 }
  0xff   :  { %v243_v29 = vadd.f32 %v221_v26, %v70_v25  ;;  %v1056_v25 = vld [vmem:[%s1643_s7 + $0x28] sm:$0xf0] }
 0x100   :  { %v278_v32 = vld [vmem:[#allocation2 + $0x58] sm:$0xff]  ;;  %v1059_v26 = vor.u32 %v1120_v22, %v1056_v25 }
 0x101   :  { %260 = vst.msk [vmem:[#allocation2 + $0x60] sm:$0xff] %vm41_vm1, %v243_v29  ;;  %v390_v34 = vmul.f32 %v357_v31, %v278_v32  ;;  %v1046_v29 = vld [vmem:[%s1643_s7 + $0x10] sm:$0xf]  ;;  %v1118_v31 = vld [vmem:[%s1643_s7 + $0x14] sm:$0xf]  ;;  %v377_v32 = vpop.permute.xlu0 %376  ;;  %v1578_v47 = vpop.f32.mrf.mxu2 }
 0x102   :  { %808 = vmatpush.bf16.msrb.mxu1 %v1059_v26 }
 0x103   :  { %v400_v35 = vpack.c.bf16 %v390_v34, %v389_v33  ;;  %v372_v33 = vpop.permute.xlu2 %371 }
 0x105   :  { %1033 = vmatmul.msk.bf16.gmra.mxu2 %vm41_vm1, %v400_v35  ;;  %v1047_v35 = vor.u32 %v1119_v30, %v1046_v29 }
 0x106   :  { %v223_v40 = vpop.f32.mrf.mxu0 }
 0x107   :  { %v244_v45 = vadd.f32 %v223_v40, %v71_v36  ;;  %v1048_v36 = vld [vmem:[%s1643_s7 + $0x18] sm:$0xf0]  ;;  %760 = vmatpush.bf16.msrb.mxu3 %v1047_v35 }
 0x108   :  { %v279_v62 = vld [vmem:[#allocation2 + $0x60] sm:$0xff]  ;;  %v1051_v39 = vor.u32 %v1118_v31, %v1048_v36 }
 0x109   :  { %261 = vst.msk [vmem:[#allocation2 + $0x68] sm:$0xff] %vm41_vm1, %v244_v45  ;;  %v391_v6 = vmul.f32 %v362_v2, %v279_v62  ;;  %v1040_v45 = vld [vmem:[%s1643_s7 + $0x8] sm:$0xf0]  ;;  %v1580_v48 = vpop.f32.mrf.mxu2 }
 0x10a   :  { %809 = vmatpush.bf16.msrb.mxu1 %v1051_v39  ;;  %v1043_v46 = vor.u32 %v1116_v43, %v1040_v45  ;;  %v528_v43 = vpop.f32.mrf.mxu3 }
 0x10b   :  { %761 = vmatpush.bf16.msrb.mxu3 %v1039_v44 }
 0x10e   :  { %v226_v61 = vpop.f32.mrf.mxu0  ;;  %810 = vmatpush.bf16.msrb.mxu1 %v1043_v46 }
 0x10f   :  { %v245_v1 = vadd.f32 %v226_v61, %v72_v56 }
 0x110   :  { %v280_v4 = vld [vmem:[#allocation2 + $0x68] sm:$0xff] }
 0x111   :  { %262 = vst.msk [vmem:[#allocation2 + $0x70] sm:$0xff] %vm41_vm1, %v245_v1  ;;  %v392_v7 = vmul.f32 %v367_v3, %v280_v4 }
 0x113   :  { %v401_v10 = vpack.c.bf16 %v392_v7, %v391_v6 }
 0x115   :  { %1034 = vmatmul.msk.bf16.gmra.mxu2 %vm41_vm1, %v401_v10 }
 0x116   :  { %v228_v12 = vpop.f32.mrf.mxu0 }
 0x117   :  { %v246_v13 = vadd.f32 %v228_v12, %v73_v11 }
 0x118   :  { %v281_v28 = vld [vmem:[#allocation2 + $0x70] sm:$0xff] }
 0x119   :  { %263 = vst.msk [vmem:[#allocation2 + $0x78] sm:$0xff] %vm41_vm1, %v246_v13  ;;  %v393_v37 = vmul.f32 %v372_v33, %v281_v28  ;;  %v510_v13 = vpop.f32.mrf.mxu1 }
 0x11e   :  { %v498_v50 = vpop.f32.mrf.mxu0 }
 0x120   :  { %v282_v34 = vld [vmem:[#allocation2 + $0x78] sm:$0xff] }
 0x121   :  { %v394_v38 = vmul.f32 %v377_v32, %v282_v34 }
 0x123   :  { %v402_v40 = vpack.c.bf16 %v394_v38, %v393_v37 }
 0x125   :  { %1035 = vmatmul.msk.bf16.gmra.mxu2 %vm41_vm1, %v402_v40 }
 0x126   :  { %v500_v54 = vpop.f32.mrf.mxu0 }
 0x138   :  { %v574_v51 = vpop.f32.mrf.mxu2 }
 0x139   :  { %v575_v52 = vadd.f32 %v574_v51, %v498_v50  ;;  %v530_v51 = vpop.f32.mrf.mxu3 }
 0x13b   :  { %v618_v56 = vadd.f32 %v1585_v53, %v575_v52 }
 0x13d   :  { %v634_v60 = vmax.f32 %v618_v56, 0.0 }
 0x140   :  { %v576_v55 = vpop.f32.mrf.mxu2 }
 0x141   :  { %v577_v57 = vadd.f32 %v576_v55, %v500_v54 }
 0x143   :  { %v619_v59 = vadd.f32 %v1585_v53, %v577_v57 }
 0x145   :  { %v635_v61 = vmax.f32 %v619_v59, 0.0 }
 0x147   :  { %v650_v62 = vpack.c.bf16 %v635_v61, %v634_v60 }
 0x148   :  { %v579_v63 = vpop.f32.mrf.mxu2 }
 0x149   :  { %762 = vmatmul.bf16.vlgmr.msrb.gmra.mxu3 %v650_v62  ;;  %811 = vmatmul.bf16.vlgmr.msrb.gmra.mxu1 %v650_v62  ;;  %v580_v1 = vadd.f32 %v579_v63, %v503_v58 }
 0x14b   :  { %v620_v3 = vadd.f32 %v1585_v53, %v580_v1 }
 0x14d   :  { %v636_v6 = vmax.f32 %v620_v3, 0.0 }
 0x150   :  { %v581_v2 = vpop.f32.mrf.mxu2 }
 0x151   :  { %v582_v4 = vadd.f32 %v581_v2, %v505_v0 }
 0x153   :  { %v621_v5 = vadd.f32 %v1585_v53, %v582_v4 }
 0x155   :  { %v637_v7 = vmax.f32 %v621_v5, 0.0 }
 0x157   :  { %v651_v10 = vpack.c.bf16 %v637_v7, %v636_v6  ;;  %v1612_v6 = vld [vmem:[%s1644_s8] ss:$0 sm:$0xff]  ;;  %s1249_s8 = smov [#allocation5]  }
 0x158   :  { %v584_v11 = vpop.f32.mrf.mxu2  ;;  %s937_s4 = sshll.u32 %s1249_s8, 4  ;;  %s938_s4 = int_to_ptr.vmem [resolvable:$true] %s937_s4 }
 0x159   :  { %767 = vmatmul.bf16.gmra.mxu3 %v651_v10  ;;  %816 = vmatmul.bf16.gmra.mxu1 %v651_v10  ;;  %v585_v12 = vadd.f32 %v584_v11, %v508_v8 }
 0x15b   :  { %v622_v15 = vadd.f32 %v1585_v53, %v585_v12 }
 0x15d   :  { %v638_v18 = vmax.f32 %v622_v15, 0.0 }
 0x160   :  { %v586_v14 = vpop.f32.mrf.mxu2 }
 0x161   :  { %v587_v16 = vadd.f32 %v586_v14, %v510_v13 }
 0x163   :  { %v623_v17 = vadd.f32 %v1585_v53, %v587_v16 }
 0x165   :  { %v639_v19 = vmax.f32 %v623_v17, 0.0 }
 0x167   :  { %v652_v20 = vpack.c.bf16 %v639_v19, %v638_v18 }
 0x168   :  { %v589_v21 = vpop.f32.mrf.mxu2 }
 0x169   :  { %772 = vmatmul.bf16.gmra.mxu3 %v652_v20  ;;  %821 = vmatmul.bf16.gmra.mxu1 %v652_v20  ;;  %v590_v22 = vadd.f32 %v589_v21, %v1467_v27 }
 0x16b   :  { %v624_v25 = vadd.f32 %v1585_v53, %v590_v22 }
 0x16d   :  { %v640_v29 = vmax.f32 %v624_v25, 0.0 }
 0x170   :  { %v591_v24 = vpop.f32.mrf.mxu2 }
 0x171   :  { %v592_v26 = vadd.f32 %v591_v24, %v1495_v49 }
 0x173   :  { %v625_v28 = vadd.f32 %v1585_v53, %v592_v26 }
 0x175   :  { %v641_v30 = vmax.f32 %v625_v28, 0.0 }
 0x177   :  { %v653_v31 = vpack.c.bf16 %v641_v30, %v640_v29 }
 0x178   :  { %v594_v32 = vpop.f32.mrf.mxu2 }
 0x179   :  { %777 = vmatmul.bf16.gmra.mxu3 %v653_v31  ;;  %826 = vmatmul.bf16.gmra.mxu1 %v653_v31  ;;  %v595_v33 = vadd.f32 %v594_v32, %v1523_v9 }
 0x17b   :  { %v626_v35 = vadd.f32 %v1585_v53, %v595_v33 }
 0x17d   :  { %v642_v37 = vmax.f32 %v626_v35, 0.0 }
 0x180   :  { %v596_v34 = vpop.f32.mrf.mxu2 }
 0x181   :  { %v597_v27 = vadd.f32 %v596_v34, %v1548_v23 }
 0x183   :  { %v627_v36 = vadd.f32 %v1585_v53, %v597_v27 }
 0x185   :  { %v643_v38 = vmax.f32 %v627_v36, 0.0 }
 0x187   :  { %v654_v49 = vpack.c.bf16 %v643_v38, %v642_v37 }
 0x188   :  { %v599_v39 = vpop.f32.mrf.mxu2 }
 0x189   :  { %782 = vmatmul.bf16.gmra.mxu3 %v654_v49  ;;  %831 = vmatmul.bf16.gmra.mxu1 %v654_v49  ;;  %v600_v40 = vadd.f32 %v599_v39, %v1578_v47 }
 0x18b   :  { %v628_v42 = vadd.f32 %v1585_v53, %v600_v40 }
 0x18d   :  { %v644_v45 = vmax.f32 %v628_v42, 0.0 }
 0x190   :  { %v601_v41 = vpop.f32.mrf.mxu2 }
 0x191   :  { %v602_v9 = vadd.f32 %v601_v41, %v1580_v48  ;;  %v533_v48 = vpop.f32.mrf.mxu3 }
 0x193   :  { %v629_v44 = vadd.f32 %v1585_v53, %v602_v9 }
 0x195   :  { %v645_v23 = vmax.f32 %v629_v44, 0.0 }
 0x197   :  { %v655_v46 = vpack.c.bf16 %v645_v23, %v644_v45 }
 0x198   :  { %v604_v50 = vpop.f32.mrf.mxu2 }
 0x199   :  { %787 = vmatmul.bf16.gmra.mxu3 %v655_v46  ;;  %836 = vmatmul.bf16.gmra.mxu1 %v655_v46  ;;  %v605_v52 = vadd.f32 %v604_v50, %v528_v43  ;;  %v535_v62 = vpop.f32.mrf.mxu3 }
 0x19b   :  { %v630_v55 = vadd.f32 %v1585_v53, %v605_v52 }
 0x19d   :  { %v646_v57 = vmax.f32 %v630_v55, 0.0 }
 0x1a0   :  { %v606_v54 = vpop.f32.mrf.mxu2 }
 0x1a1   :  { %v607_v47 = vadd.f32 %v606_v54, %v530_v51 }
 0x1a3   :  { %v631_v56 = vadd.f32 %v1585_v53, %v607_v47 }
 0x1a5   :  { %v647_v58 = vmax.f32 %v631_v56, 0.0 }
 0x1a7   :  { %v656_v59 = vpack.c.bf16 %v647_v58, %v646_v57 }
 0x1a8   :  { %v609_v60 = vpop.f32.mrf.mxu2 }
 0x1a9   :  { %792 = vmatmul.bf16.gmra.mxu3 %v656_v59  ;;  %841 = vmatmul.bf16.gmra.mxu1 %v656_v59  ;;  %v610_v61 = vadd.f32 %v609_v60, %v533_v48 }
 0x1ab   :  { %v632_v0 = vadd.f32 %v1585_v53, %v610_v61 }
 0x1ad   :  { %v648_v3 = vmax.f32 %v632_v0, 0.0 }
 0x1b0   :  { %v611_v63 = vpop.f32.mrf.mxu2 }
 0x1b1   :  { %v612_v1 = vadd.f32 %v611_v63, %v535_v62 }
 0x1b3   :  { %v633_v2 = vadd.f32 %v1585_v53, %v612_v1 }
 0x1b5   :  { %v649_v4 = vmax.f32 %v633_v2, 0.0 }
 0x1b7   :  { %v657_v5 = vpack.c.bf16 %v649_v4, %v648_v3 }
 0x1b9   :  { %797 = vmatmul.bf16.gmra.mxu3 %v657_v5  ;;  %846 = vmatmul.bf16.gmra.mxu1 %v657_v5 }
 0x1c6   :  { %v812_v7 = vpop.f32.mrf.mxu1 }
 0x1c7   :  { %v888_v8 = vadd.f32 %v1612_v6, %v812_v7 }
 0x1c9   :  { %904 = vst [vmem:[#allocation5] sm:$0xff] %v888_v8 }
 0x1cc   :  { %v763_v10 = vpop.f32.mrf.mxu3 }
 0x1ce   :  { %v814_v11 = vpop.f32.mrf.mxu1 }
 0x1cf   :  { %v889_v12 = vadd.f32 %v1612_v6, %v814_v11 }
 0x1d1   :  { %905 = vst [vmem:[#allocation5 + $0x8] sm:$0xff] %v889_v12 }
 0x1d4   :  { %v765_v53 = vpop.f32.mrf.mxu3 }
 0x1d5   :  { %v1135_v13 = vpack.c.bf16 %v765_v53, %v763_v10 }
 0x1d6   :  { %v817_v14 = vpop.f32.mrf.mxu1 }
 0x1d7   :  { %1136 = vst [vmem:[#allocation3] sm:$0xff] %v1135_v13   ;;  %v890_v15 = vadd.f32 %v1612_v6, %v817_v14 }
 0x1d9   :  { %906 = vst [vmem:[#allocation5 + $0x10] sm:$0xff] %v890_v15 }
 0x1dc   :  { %v768_v16 = vpop.f32.mrf.mxu3 }
 0x1de   :  { %v819_v17 = vpop.f32.mrf.mxu1 }
 0x1df   :  { %v891_v18 = vadd.f32 %v1612_v6, %v819_v17 }
 0x1e1   :  { %907 = vst [vmem:[#allocation5 + $0x18] sm:$0xff] %v891_v18 }
 0x1e4   :  { %v770_v19 = vpop.f32.mrf.mxu3 }
 0x1e5   :  { %v1140_v20 = vpack.c.bf16 %v770_v19, %v768_v16 }
 0x1e6   :  { %v822_v21 = vpop.f32.mrf.mxu1 }
 0x1e7   :  { %1172 = vst [vmem:[#allocation3 + $0x8] sm:$0xff] %v1140_v20   ;;  %v892_v22 = vadd.f32 %v1612_v6, %v822_v21 }
 0x1e9   :  { %908 = vst [vmem:[#allocation5 + $0x20] sm:$0xff] %v892_v22 }
 0x1ec   :  { %v773_v24 = vpop.f32.mrf.mxu3 }
 0x1ee   :  { %v824_v25 = vpop.f32.mrf.mxu1 }
 0x1ef   :  { %v893_v26 = vadd.f32 %v1612_v6, %v824_v25 }
 0x1f1   :  { %909 = vst [vmem:[#allocation5 + $0x28] sm:$0xff] %v893_v26 }
 0x1f4   :  { %v775_v28 = vpop.f32.mrf.mxu3 }
 0x1f5   :  { %v1145_v29 = vpack.c.bf16 %v775_v28, %v773_v24 }
 0x1f6   :  { %v827_v30 = vpop.f32.mrf.mxu1 }
 0x1f7   :  { %1173 = vst [vmem:[#allocation3 + $0x10] sm:$0xff] %v1145_v29   ;;  %v894_v31 = vadd.f32 %v1612_v6, %v827_v30 }
 0x1f9   :  { %910 = vst [vmem:[#allocation5 + $0x30] sm:$0xff] %v894_v31 }
 0x1fc   :  { %v778_v32 = vpop.f32.mrf.mxu3 }
 0x1fe   :  { %v829_v33 = vpop.f32.mrf.mxu1 }
 0x1ff   :  { %v895_v34 = vadd.f32 %v1612_v6, %v829_v33 }
 0x201   :  { %911 = vst [vmem:[#allocation5 + $0x38] sm:$0xff] %v895_v34 }
 0x204   :  { %v780_v35 = vpop.f32.mrf.mxu3 }
 0x205   :  { %v1150_v27 = vpack.c.bf16 %v780_v35, %v778_v32 }
 0x206   :  { %v832_v36 = vpop.f32.mrf.mxu1 }
 0x207   :  { %1174 = vst [vmem:[#allocation3 + $0x18] sm:$0xff] %v1150_v27   ;;  %v896_v37 = vadd.f32 %v1612_v6, %v832_v36 }
 0x209   :  { %912 = vst [vmem:[#allocation5 + $0x40] sm:$0xff] %v896_v37 }
 0x20c   :  { %v783_v38 = vpop.f32.mrf.mxu3 }
 0x20e   :  { %v834_v49 = vpop.f32.mrf.mxu1 }
 0x20f   :  { %v897_v39 = vadd.f32 %v1612_v6, %v834_v49 }
 0x211   :  { %913 = vst [vmem:[#allocation5 + $0x48] sm:$0xff] %v897_v39 }
 0x214   :  { %v785_v40 = vpop.f32.mrf.mxu3 }
 0x215   :  { %v1155_v41 = vpack.c.bf16 %v785_v40, %v783_v38 }
 0x216   :  { %v837_v42 = vpop.f32.mrf.mxu1 }
 0x217   :  { %1175 = vst [vmem:[#allocation3 + $0x20] sm:$0xff] %v1155_v41   ;;  %v898_v9 = vadd.f32 %v1612_v6, %v837_v42 }
 0x219   :  { %914 = vst [vmem:[#allocation5 + $0x50] sm:$0xff] %v898_v9 }
 0x21c   :  { %v788_v43 = vpop.f32.mrf.mxu3 }
 0x21e   :  { %v839_v44 = vpop.f32.mrf.mxu1 }
 0x21f   :  { %v899_v45 = vadd.f32 %v1612_v6, %v839_v44 }
 0x221   :  { %915 = vst [vmem:[#allocation5 + $0x58] sm:$0xff] %v899_v45 }
 0x224   :  { %v790_v23 = vpop.f32.mrf.mxu3 }
 0x225   :  { %v1160_v46 = vpack.c.bf16 %v790_v23, %v788_v43 }
 0x226   :  { %v842_v50 = vpop.f32.mrf.mxu1 }
 0x227   :  { %1176 = vst [vmem:[#allocation3 + $0x28] sm:$0xff] %v1160_v46   ;;  %v900_v51 = vadd.f32 %v1612_v6, %v842_v50 }
 0x229   :  { %916 = vst [vmem:[#allocation5 + $0x60] sm:$0xff] %v900_v51 }
 0x22c   :  { %v793_v52 = vpop.f32.mrf.mxu3 }
 0x22e   :  { %v844_v54 = vpop.f32.mrf.mxu1 }
 0x22f   :  { %v901_v55 = vadd.f32 %v1612_v6, %v844_v54 }
 0x231   :  { %917 = vst [vmem:[#allocation5 + $0x68] sm:$0xff] %v901_v55 }
 0x234   :  { %v795_v47 = vpop.f32.mrf.mxu3 }
 0x235   :  { %v1165_v56 = vpack.c.bf16 %v795_v47, %v793_v52 }
 0x236   :  { %v847_v57 = vpop.f32.mrf.mxu1 }
 0x237   :  { %1177 = vst [vmem:[#allocation3 + $0x30] sm:$0xff] %v1165_v56   ;;  %v902_v58 = vadd.f32 %v1612_v6, %v847_v57 }
 0x239   :  { %918 = vst [vmem:[#allocation5 + $0x70] sm:$0xff] %v902_v58 }
 0x23c   :  { %v798_v48 = vpop.f32.mrf.mxu3 }
 0x23e   :  { %v849_v59 = vpop.f32.mrf.mxu1 }
 0x23f   :  { %v903_v60 = vadd.f32 %v1612_v6, %v849_v59 }
 0x241   :  { %919 = vst [vmem:[#allocation5 + $0x78] sm:$0xff] %v903_v60 }
 0x242   :  { %945 = dma.vmem_to_hbm [thread:$0]  %s938_s4, 2048, %s940_s13, [#allocation6], %s1251_s19, %s1251_s19, %s1252_s20  }
 0x244   :  { %v800_v61 = vpop.f32.mrf.mxu3 }
 0x245   :  { %v1170_v62 = vpack.c.bf16 %v800_v61, %v798_v48 }
 0x247   :  { %1178 = vst [vmem:[#allocation3 + $0x38] sm:$0xff] %v1170_v62  }
 0x248   :  { %932 = dma.vmem_to_hbm [thread:$0]  %s925_s15, 1024, %s927_s18, [#allocation4], %s1253_s10, %s1253_s10, %s1254_s5  }
 0x249   :  { %1243 = dma.done.wait [#allocation4], 1024  }
 0x24a   :  { %1244 = vsyncadd [#allocation4], 4294966272 }
 0x24b   :  { %1245 = dma.done.wait [#allocation6], 2048  }
 0x24c   :  { %1246 = vsyncadd [#allocation6], 4294965248 }
 0x24d   :  { %954 = vsyncpa [#allocation4], 1 }
 0x24e   :  { %955 = vsyncpa [#allocation6], 1 }

</bundles_post_ra>
